<compile_context>
chip_gen: v5e
topology: v5e:2x2
jax: 0.10.0
libtpu: 0.0.40
codegen_flags: <defaults>
</compile_context>

<pallas_src>
import functools
import math

import jax
import jax.numpy as jnp
from jax.experimental import pallas as pl
from jax.experimental.pallas import tpu as pltpu


def _round_up(x, m):
    return ((x + m - 1) // m) * m


def _time_linear_kernel(t_ref, x_ref, freqs_ref,
                        w1_ref, b1_ref, w2_ref, b2_ref,
                        wfc_ref, bfc_ref, o_ref, *, dim_in):
    # ---- sinusoidal timestep embedding ----
    t = t_ref[...]                                  # (TILE_M, 1) f32
    args = t * freqs_ref[...]                       # (TILE_M, half) f32
    # cos/sin in f32 (v5e EUP has no bf16 path); cast to bf16 only for the MXU.
    # Concat is at a 128-lane boundary -> layout-free; gives one K=256 matmul
    # that fills v6e/v7x's 256-deep MXU in a single weight pass.
    emb = jnp.concatenate([jnp.cos(args), jnp.sin(args)], axis=-1)
    emb = emb.astype(jnp.bfloat16)                  # (TILE_M, 2*half) bf16

    # MLP layer 1 (bf16 operands, f32 accumulation) + SiLU.
    h = jnp.dot(emb, w1_ref[...], preferred_element_type=jnp.float32) + b1_ref[...]
    sig = pl.reciprocal(1.0 + jnp.exp(-h), approx=True)   # EUP exp + approx vrcp
    h = h * sig                                     # SiLU, f32

    # MLP layer 2 -> alpha (TILE_M, dim_out), bf16 MXU, f32 accumulate.
    alpha = (jnp.dot(h.astype(jnp.bfloat16), w2_ref[...],
                     preferred_element_type=jnp.float32) + b2_ref[...])

    # ---- fc(x): tiny-K path uses VPU broadcast-FMAs, large K uses the MXU ----
    x = x_ref[...]                                  # (TILE_M, dim_in) f32
    if dim_in <= 16:
        xo = x[:, 0:1] * wfc_ref[0:1, :]
        for k in range(1, dim_in):
            xo = xo + x[:, k:k + 1] * wfc_ref[k:k + 1, :]
        xo = xo + bfc_ref[...]
    else:
        xo = jnp.dot(x, wfc_ref[...], preferred_element_type=jnp.float32) + bfc_ref[...]

    # ---- modulate (lane-dense store, dim_out is a multiple of 128) ----
    o_ref[...] = alpha * xo


def time_linear(x, t, params, dim_out, freq_dim=256, max_tile_m=1024):
    """x: (N, dim_in) f32, t: (N,) f32 -> (N, dim_out) f32."""
    N, dim_in = x.shape
    half = freq_dim // 2
    freqs = params["freqs"].reshape(1, half)

    # Split rows over >=2 grid steps first (so v7x can shard across its 2 TCs),
    # then grow the tile (cap 1024) so per-step compute dwarfs pipeline cost.
    tile_m = max(8, min(max_tile_m, _round_up(pl.cdiv(N, 2), 8)))
    grid = (pl.cdiv(N, tile_m),)   # ragged last block is clipped by Pallas

    t2d = t.astype(jnp.float32).reshape(N, 1)

    # bf16 weights for the MXU (f32 accumulation); biases and fc stay f32.
    # (Callers may pre-cast once to avoid the per-call conversion.)
    w1 = params["w1"].astype(jnp.bfloat16)
    w2 = params["w2"].astype(jnp.bfloat16)
    b1, b2 = params["b1"], params["b2"]
    wfc, bfc = params["wfc"], params["bfc"]

    const = lambda a: pl.BlockSpec(a.shape, lambda i: (0, 0))  # VMEM-resident

    flops = 2 * N * dim_out * (freq_dim + dim_out + dim_in)
    transcendentals = N * (freq_dim + dim_out)                 # cos/sin + exp
    bytes_accessed = (4 * (x.size + t2d.size + freqs.size + b1.size + b2.size
                           + wfc.size + bfc.size + N * dim_out)
                      + 2 * (w1.size + w2.size))

    kernel = functools.partial(_time_linear_kernel, dim_in=dim_in)
    return pl.pallas_call(
        kernel,
        out_shape=jax.ShapeDtypeStruct((N, dim_out), jnp.float32),
        grid=grid,
        in_specs=[
            pl.BlockSpec((tile_m, 1), lambda i: (i, 0)),        # t
            pl.BlockSpec((tile_m, dim_in), lambda i: (i, 0)),   # x
            const(freqs),
            const(w1), const(b1), const(w2), const(b2),
            const(wfc), const(bfc),
        ],
        out_specs=pl.BlockSpec((tile_m, dim_out), lambda i: (i, 0)),
        compiler_params=pltpu.CompilerParams(
            dimension_semantics=("parallel",)),
        cost_estimate=pl.CostEstimate(
            flops=flops,
            transcendentals=transcendentals,
            bytes_accessed=bytes_accessed),
    )(t2d, x, freqs, w1, b1, w2, b2, wfc, bfc)


def init_params(key, dim_in, dim_out, freq_dim=256):
    """Deterministic synthetic parameters (shapes match the PyTorch module)."""
    ks = jax.random.split(key, 6)

    def lin(k, fan_in, fan_out):
        bound = 1.0 / math.sqrt(fan_in)
        kw, kb = jax.random.split(k)
        w = jax.random.uniform(kw, (fan_in, fan_out), jnp.float32, -bound, bound)
        b = jax.random.uniform(kb, (1, fan_out), jnp.float32, -bound, bound)
        return w, b

    w1, b1 = lin(ks[0], freq_dim, dim_out)      # time_embedding.mlp[0]
    w2, b2 = lin(ks[1], dim_out, dim_out)       # time_embedding.mlp[2]
    wfc, bfc = lin(ks[2], dim_in, dim_out)      # fc

    half = freq_dim // 2
    freqs = jnp.exp(                            # precomputed once (hoisted)
        -math.log(10000.0) * jnp.arange(half, dtype=jnp.float32) / half
    ).reshape(1, half)

    return {"w1": w1, "b1": b1, "w2": w2, "b2": b2,
            "wfc": wfc, "bfc": bfc, "freqs": freqs}


def time_linear_ref(x, t, params, freq_dim=256):
    """Pure-JAX f32 reference mirroring the PyTorch forward."""
    half = freq_dim // 2
    freqs = jnp.exp(-math.log(10000.0) * jnp.arange(half, dtype=jnp.float32) / half)
    args = t.astype(jnp.float32)[:, None] * freqs[None]
    emb = jnp.concatenate([jnp.cos(args), jnp.sin(args)], axis=-1)
    h = emb @ params["w1"] + params["b1"]
    h = h * jax.nn.sigmoid(h)
    alpha = h @ params["w2"] + params["b2"]
    xo = x @ params["wfc"] + params["bfc"]
    return alpha * xo


if __name__ == "__main__":
    # TimeLinear(dim_in=2, dim_out=128, num_timesteps=1000)
    dim_in, dim_out, num_timesteps = 2, 128, 1000

    key = jax.random.PRNGKey(0)
    k_data, k_p = jax.random.split(key)
    params = init_params(k_p, dim_in, dim_out)

    # N=8: single-tile path.  N=20: grid=(2,) with a ragged last tile (tests
    # that dropping the pad/slice wrapper is correct).
    for N in (8, 20):
        kx, kt = jax.random.split(jax.random.fold_in(k_data, N))
        x = jax.random.normal(kx, (N, dim_in), dtype=jnp.float32)
        t = jax.random.randint(kt, (N,), 0, num_timesteps).astype(jnp.float32)

        out = jax.block_until_ready(time_linear(x, t, params, dim_out))
        ref = time_linear_ref(x, t, params)

        assert out.shape == (N, dim_out)
        # Tolerance loosened vs the pure-f32 version: the kernel runs the MLP
        # matmuls with bf16 operands (f32 accumulation) and an approx-EUP
        # reciprocal in SiLU, giving ~1e-2-level deviations from the f32 ref.
        assert jnp.allclose(out, ref, atol=3e-2, rtol=3e-2), \
            f"mismatch vs reference at N={N}"

    print("KERNEL_OK")
</pallas_src>

<mosaic_0001>
module attributes {stable_mosaic.version = 11 : i64} {
  func.func @_time_linear_kernel(%arg0: i32, %arg1: memref<8x1xf32, #tpu.memory_space<vmem>>, %arg2: memref<8x2xf32, #tpu.memory_space<vmem>>, %arg3: memref<1x128xf32, #tpu.memory_space<vmem>>, %arg4: memref<256x128xbf16, #tpu.memory_space<vmem>>, %arg5: memref<1x128xf32, #tpu.memory_space<vmem>>, %arg6: memref<128x128xbf16, #tpu.memory_space<vmem>>, %arg7: memref<1x128xf32, #tpu.memory_space<vmem>>, %arg8: memref<2x128xf32, #tpu.memory_space<vmem>>, %arg9: memref<1x128xf32, #tpu.memory_space<vmem>>, %arg10: memref<8x128xf32, #tpu.memory_space<vmem>>) attributes {dimension_semantics = [#tpu.dimension_semantics<parallel>], iteration_bounds = array<i64: 1>, scalar_prefetch = 0 : i64, scratch_operands = 0 : i64, tpu.core_type = #tpu.core_type<tc>, window_params = [{transform_indices = @transform_0, window_bounds = array<i64: 8, 1>}, {transform_indices = @transform_1, window_bounds = array<i64: 8, 2>}, {pipeline_mode = #tpu.pipeline_mode<synchronous>, transform_indices = @transform_2, window_bounds = array<i64: 1, 128>}, {pipeline_mode = #tpu.pipeline_mode<synchronous>, transform_indices = @transform_3, window_bounds = array<i64: 256, 128>}, {pipeline_mode = #tpu.pipeline_mode<synchronous>, transform_indices = @transform_4, window_bounds = array<i64: 1, 128>}, {pipeline_mode = #tpu.pipeline_mode<synchronous>, transform_indices = @transform_5, window_bounds = array<i64: 128, 128>}, {pipeline_mode = #tpu.pipeline_mode<synchronous>, transform_indices = @transform_6, window_bounds = array<i64: 1, 128>}, {pipeline_mode = #tpu.pipeline_mode<synchronous>, transform_indices = @transform_7, window_bounds = array<i64: 2, 128>}, {pipeline_mode = #tpu.pipeline_mode<synchronous>, transform_indices = @transform_8, window_bounds = array<i64: 1, 128>}, {transform_indices = @transform_9, window_bounds = array<i64: 8, 128>}]} {
    %c0 = arith.constant 0 : index
    %c0_0 = arith.constant 0 : index
    %0 = vector.load %arg1[%c0, %c0_0] : memref<8x1xf32, #tpu.memory_space<vmem>>, vector<8x1xf32>
    %c0_1 = arith.constant 0 : index
    %c0_2 = arith.constant 0 : index
    %1 = vector.load %arg3[%c0_1, %c0_2] : memref<1x128xf32, #tpu.memory_space<vmem>>, vector<1x128xf32>
    %2 = vector.broadcast %0 : vector<8x1xf32> to vector<8x128xf32>
    %3 = vector.broadcast %1 : vector<1x128xf32> to vector<8x128xf32>
    %4 = arith.mulf %2, %3 : vector<8x128xf32>
    %5 = math.cos %4 : vector<8x128xf32>
    %6 = math.sin %4 : vector<8x128xf32>
    %7 = tpu.concatenate %5, %6 in 1 : vector<8x128xf32>, vector<8x128xf32> -> vector<8x256xf32>
    %8 = arith.truncf %7 : vector<8x256xf32> to vector<8x256xbf16>
    %c0_3 = arith.constant 0 : index
    %c0_4 = arith.constant 0 : index
    %9 = vector.load %arg4[%c0_3, %c0_4] : memref<256x128xbf16, #tpu.memory_space<vmem>>, vector<256x128xbf16>
    %cst = arith.constant dense<0.000000e+00> : vector<8x128xf32>
    %10 = tpu.matmul %8, %9, %cst {dimension_numbers = #tpu.dot_dimension_numbers<[1], [0], [0], [1], [0, 0, 1, 1], [], []>} : vector<8x256xbf16>, vector<256x128xbf16>, vector<8x128xf32> -> vector<8x128xf32>
    %c0_5 = arith.constant 0 : index
    %c0_6 = arith.constant 0 : index
    %11 = vector.load %arg5[%c0_5, %c0_6] : memref<1x128xf32, #tpu.memory_space<vmem>>, vector<1x128xf32>
    %12 = vector.broadcast %11 : vector<1x128xf32> to vector<8x128xf32>
    %13 = arith.addf %10, %12 : vector<8x128xf32>
    %cst_7 = arith.constant 0.000000e+00 : f32
    %14 = vector.broadcast %cst_7 : f32 to vector<8x128xf32>
    %15 = arith.subf %14, %13 : vector<8x128xf32>
    %16 = math.exp %15 : vector<8x128xf32>
    %cst_8 = arith.constant 1.000000e+00 : f32
    %17 = vector.broadcast %cst_8 : f32 to vector<8x128xf32>
    %18 = arith.addf %17, %16 : vector<8x128xf32>
    %19 = tpu.reciprocal %18 {approx = true} : vector<8x128xf32> -> vector<8x128xf32>
    %20 = arith.mulf %13, %19 : vector<8x128xf32>
    %21 = arith.truncf %20 : vector<8x128xf32> to vector<8x128xbf16>
    %c0_9 = arith.constant 0 : index
    %c0_10 = arith.constant 0 : index
    %22 = vector.load %arg6[%c0_9, %c0_10] : memref<128x128xbf16, #tpu.memory_space<vmem>>, vector<128x128xbf16>
    %cst_11 = arith.constant dense<0.000000e+00> : vector<8x128xf32>
    %23 = tpu.matmul %21, %22, %cst_11 {dimension_numbers = #tpu.dot_dimension_numbers<[1], [0], [0], [1], [0, 0, 1, 1], [], []>} : vector<8x128xbf16>, vector<128x128xbf16>, vector<8x128xf32> -> vector<8x128xf32>
    %c0_12 = arith.constant 0 : index
    %c0_13 = arith.constant 0 : index
    %24 = vector.load %arg7[%c0_12, %c0_13] : memref<1x128xf32, #tpu.memory_space<vmem>>, vector<1x128xf32>
    %25 = vector.broadcast %24 : vector<1x128xf32> to vector<8x128xf32>
    %26 = arith.addf %23, %25 : vector<8x128xf32>
    %c0_14 = arith.constant 0 : index
    %c0_15 = arith.constant 0 : index
    %27 = vector.load %arg2[%c0_14, %c0_15] : memref<8x2xf32, #tpu.memory_space<vmem>>, vector<8x2xf32>
    %28 = vector.extract_strided_slice %27 {offsets = [0, 0], sizes = [8, 1], strides = [1, 1]} : vector<8x2xf32> to vector<8x1xf32>
    %c0_16 = arith.constant 0 : index
    %c0_17 = arith.constant 0 : index
    %29 = vector.load %arg8[%c0_16, %c0_17] : memref<2x128xf32, #tpu.memory_space<vmem>>, vector<1x128xf32>
    %30 = vector.broadcast %28 : vector<8x1xf32> to vector<8x128xf32>
    %31 = vector.broadcast %29 : vector<1x128xf32> to vector<8x128xf32>
    %32 = arith.mulf %30, %31 : vector<8x128xf32>
    %33 = vector.extract_strided_slice %27 {offsets = [0, 1], sizes = [8, 1], strides = [1, 1]} : vector<8x2xf32> to vector<8x1xf32>
    %c1 = arith.constant 1 : index
    %c0_18 = arith.constant 0 : index
    %34 = vector.load %arg8[%c1, %c0_18] : memref<2x128xf32, #tpu.memory_space<vmem>>, vector<1x128xf32>
    %35 = vector.broadcast %33 : vector<8x1xf32> to vector<8x128xf32>
    %36 = vector.broadcast %34 : vector<1x128xf32> to vector<8x128xf32>
    %37 = arith.mulf %35, %36 : vector<8x128xf32>
    %38 = arith.addf %32, %37 : vector<8x128xf32>
    %c0_19 = arith.constant 0 : index
    %c0_20 = arith.constant 0 : index
    %39 = vector.load %arg9[%c0_19, %c0_20] : memref<1x128xf32, #tpu.memory_space<vmem>>, vector<1x128xf32>
    %40 = vector.broadcast %39 : vector<1x128xf32> to vector<8x128xf32>
    %41 = arith.addf %38, %40 : vector<8x128xf32>
    %42 = arith.mulf %26, %41 : vector<8x128xf32>
    %c0_21 = arith.constant 0 : index
    %c0_22 = arith.constant 0 : index
    %43 = vector.load %arg10[%c0_21, %c0_22] : memref<8x128xf32, #tpu.memory_space<vmem>>, vector<8x128xf32>
    tpu.vector_store %arg10[%c0_21, %c0_22], %42 {strides = array<i32>} : memref<8x128xf32, #tpu.memory_space<vmem>>, vector<8x128xf32>,
    return
  }
  func.func @transform_0(%arg0: i32) -> (i32, i32) {
    %c0_i32 = arith.constant 0 : i32
    %c0_i32_0 = arith.constant 0 : i32
    return %arg0, %c0_i32 : i32, i32
  }
  func.func @transform_1(%arg0: i32) -> (i32, i32) {
    %c0_i32 = arith.constant 0 : i32
    %c0_i32_0 = arith.constant 0 : i32
    return %arg0, %c0_i32 : i32, i32
  }
  func.func @transform_2(%arg0: i32) -> (i32, i32) {
    %c0_i32 = arith.constant 0 : i32
    %c0_i32_0 = arith.constant 0 : i32
    %c0_i32_1 = arith.constant 0 : i32
    return %c0_i32, %c0_i32_0 : i32, i32
  }
  func.func @transform_3(%arg0: i32) -> (i32, i32) {
    %c0_i32 = arith.constant 0 : i32
    %c0_i32_0 = arith.constant 0 : i32
    %c0_i32_1 = arith.constant 0 : i32
    return %c0_i32, %c0_i32_0 : i32, i32
  }
  func.func @transform_4(%arg0: i32) -> (i32, i32) {
    %c0_i32 = arith.constant 0 : i32
    %c0_i32_0 = arith.constant 0 : i32
    %c0_i32_1 = arith.constant 0 : i32
    return %c0_i32, %c0_i32_0 : i32, i32
  }
  func.func @transform_5(%arg0: i32) -> (i32, i32) {
    %c0_i32 = arith.constant 0 : i32
    %c0_i32_0 = arith.constant 0 : i32
    %c0_i32_1 = arith.constant 0 : i32
    return %c0_i32, %c0_i32_0 : i32, i32
  }
  func.func @transform_6(%arg0: i32) -> (i32, i32) {
    %c0_i32 = arith.constant 0 : i32
    %c0_i32_0 = arith.constant 0 : i32
    %c0_i32_1 = arith.constant 0 : i32
    return %c0_i32, %c0_i32_0 : i32, i32
  }
  func.func @transform_7(%arg0: i32) -> (i32, i32) {
    %c0_i32 = arith.constant 0 : i32
    %c0_i32_0 = arith.constant 0 : i32
    %c0_i32_1 = arith.constant 0 : i32
    return %c0_i32, %c0_i32_0 : i32, i32
  }
  func.func @transform_8(%arg0: i32) -> (i32, i32) {
    %c0_i32 = arith.constant 0 : i32
    %c0_i32_0 = arith.constant 0 : i32
    %c0_i32_1 = arith.constant 0 : i32
    return %c0_i32, %c0_i32_0 : i32, i32
  }
  func.func @transform_9(%arg0: i32) -> (i32, i32) {
    %c0_i32 = arith.constant 0 : i32
    %c0_i32_0 = arith.constant 0 : i32
    return %arg0, %c0_i32 : i32, i32
  }
}

</mosaic_0001>

<bundles_post_ra>
// kernel: tpu_custom_call.1
= control target key start
LH: loop header
LB: loop body
LE: loop exit
PB: predicated region body
PF: predicated region fallthrough
CT: control target
= control target key end

     0   :  { %14 = vsyncpa [#allocation3], 0  ;;  %s1062_s0 = inlined_call_operand.vmem [shape: f32[8,1], index: 0, kind: input, shape index: {}]   ;;  %s1063_s1 = inlined_call_operand.vmem [shape: f32[8,2], index: 1, kind: input, shape index: {}]   ;;  %s1064_s2 = inlined_call_operand.vmem [shape: f32[1,128], index: 2, kind: input, shape index: {}]   ;;  %s1065_s3 = inlined_call_operand.hbm [shape: bf16[256,128], index: 3, kind: input, shape index: {}]   ;;  %s1066_s4 = inlined_call_operand.vmem [shape: f32[1,128], index: 4, kind: input, shape index: {}]   ;;  %s1067_s5 = inlined_call_operand.hbm [shape: bf16[128,128], index: 5, kind: input, shape index: {}]   ;;  %s1068_s6 = inlined_call_operand.vmem [shape: f32[1,128], index: 6, kind: input, shape index: {}]   ;;  %s1069_s7 = inlined_call_operand.vmem [shape: f32[2,128], index: 7, kind: input, shape index: {}]   ;;  %s1070_s8 = inlined_call_operand.vmem [shape: f32[1,128], index: 8, kind: input, shape index: {}]   ;;  %s1071_s9 = inlined_call_operand.hbm [shape: f32[8,128], index: 9, kind: output, shape index: {}]  }
   0x1   :  { %15 = vsyncpa [#allocation6], 0 }
   0x2   :  { %16 = vsyncpa [#allocation4], 0  ;;  %s27_s11 = sshll.u32 %s1065_s3, 4  ;;  %s905_s12 = smov [#allocation2]   ;;  %s28_s11 = int_to_ptr.hbm [resolvable:$true] %s27_s11 }
   0x3   :  { %s29_s13 = sshll.u32 %s905_s12, 4  ;;  %s42_s16 = sshll.u32 %s1067_s5, 4  ;;  %s30_s13 = int_to_ptr.vmem [resolvable:$true] %s29_s13  ;;  %s43_s16 = int_to_ptr.hbm [resolvable:$true] %s42_s16 }
   0x4   :  { %s906_s17 = smov 64   ;;  %s907_s18 = smov 4  }
   0x5   :  { %35 = dma.hbm_to_vmem [thread:$0]  %s28_s11, 2048, %s30_s13, [#allocation3], %s906_s17, %s906_s17, %s907_s18  }
   0x6   :  { %s908_s19 = smov [#allocation5]  }
   0x7   :  { %s44_s20 = sshll.u32 %s908_s19, 4  ;;  %s45_s20 = int_to_ptr.vmem [resolvable:$true] %s44_s20 }
   0x8   :  { %50 = dma.hbm_to_vmem [thread:$0]  %s43_s16, 1024, %s45_s20, [#allocation6], %s906_s17, %s906_s17, %s907_s18  }
   0x9   :  { %899 = dma.done.wait [#allocation3], 2048  }
   0xa   :  { %900 = vsyncadd [#allocation3], 4294965248 }
   0xb   :  { %901 = dma.done.wait [#allocation6], 1024  }
   0xc   :  { %902 = vsyncadd [#allocation6], 4294966272  ;;  %v909_v0 = vmov 0   ;;  %v910_v1 = vmov 1   ;;  %v65_v2 = vld [vmem:[%s1062_s0] sm:$0xff]  ;;  %v784_v4 = vld [vmem:[#allocation2 + $0x38] sm:$0xff] }
   0xd   :  { %814 = vset.pattern.permute.xlu0 %v909_v0  ;;  %815 = vset.pattern.permute.xlu1 %v910_v1  ;;  %v633_v3 = vld [vmem:[%s1063_s1] sm:$0xff]  ;;  %v792_v5 = vld [vmem:[#allocation2 + $0x78] sm:$0xff]  ;;  %v783_v6 = vld [vmem:[#allocation2 + $0x30] sm:$0xff]  ;;  %v911_v32 = vmov 683565275   ;;  %s917_s10 = smov [#allocation7]  }
   0xe   :  { %69 = vperm.xlu0 %814, %v65_v2   ;;  %644 = vperm.xlu1 %815, %v633_v3   ;;  %v791_v7 = vld [vmem:[#allocation2 + $0x70] sm:$0xff]  ;;  %v817_v8 = vld [vmem:[%s1064_s2] ss:$0 sm:$0xff]  ;;  %v782_v9 = vld [vmem:[#allocation2 + $0x28] sm:$0xff]  ;;  %v912_v34 = vmov 2475754826  }
   0xf   :  { %519 = vmatpush.bf16.msra.mxu0 %v784_v4  ;;  %532 = vmatpush.bf16.msra.mxu1 %v792_v5  ;;  %v790_v10 = vld [vmem:[#allocation2 + $0x68] sm:$0xff]  ;;  %v781_v13 = vld [vmem:[#allocation2 + $0x20] sm:$0xff]  ;;  %v780_v17 = vld [vmem:[#allocation2 + $0x18] sm:$0xff]  ;;  %v913_v36 = vmov 2131351028   ;;  %s662_s11 = sshll.u32 %s917_s10, 4  ;;  %s663_s11 = int_to_ptr.vmem [resolvable:$true] %s662_s11 }
  0x10   :  { %v789_v14 = vld [vmem:[#allocation2 + $0x60] sm:$0xff]  ;;  %v788_v18 = vld [vmem:[#allocation2 + $0x58] sm:$0xff]  ;;  %v779_v22 = vld [vmem:[#allocation2 + $0x10] sm:$0xff]  ;;  %v914_v38 = vmov 2102212464  }
  0x11   :  { %v787_v23 = vld [vmem:[#allocation2 + $0x50] sm:$0xff]  ;;  %v778_v27 = vld [vmem:[#allocation2 + $0x8] sm:$0xff]  ;;  %v915_v43 = vmov 920167782   ;;  %v777_v45 = vld [vmem:[#allocation2] sm:$0xff] }
  0x12   :  { %v786_v29 = vld [vmem:[#allocation2 + $0x48] sm:$0xff]  ;;  %v916_v47 = vmov 1326507024   ;;  %v785_v50 = vld [vmem:[#allocation2 + $0x40] sm:$0xff] }
  0x13   :  { %520 = vmatpush.bf16.msra.mxu0 %v783_v6  ;;  %533 = vmatpush.bf16.msra.mxu1 %v791_v7 }
  0x16   :  { %637 = vperm.xlu0 %814, %v633_v3  }
  0x17   :  { %521 = vmatpush.bf16.msra.mxu0 %v782_v9  ;;  %534 = vmatpush.bf16.msra.mxu1 %v790_v10 }
  0x1b   :  { %522 = vmatpush.bf16.msra.mxu0 %v781_v13  ;;  %535 = vmatpush.bf16.msra.mxu1 %v789_v14 }
  0x1e   :  { %816 = vset.pattern.permute.xlu0 %v910_v1 }
  0x1f   :  { %523 = vmatpush.bf16.msra.mxu0 %v780_v17  ;;  %536 = vmatpush.bf16.msra.mxu1 %v788_v18 }
  0x23   :  { %524 = vmatpush.bf16.msra.mxu0 %v779_v22  ;;  %537 = vmatpush.bf16.msra.mxu1 %v787_v23 }
  0x27   :  { %525 = vmatpush.bf16.msra.mxu0 %v778_v27  ;;  %538 = vmatpush.bf16.msra.mxu1 %v786_v29 }
  0x2b   :  { %526 = vmatpush.bf16.msra.mxu0 %v777_v45  ;;  %539 = vmatpush.bf16.msra.mxu1 %v785_v50 }
  0x80   :  { %v70_v11 = vpop.permute.xlu0 %69 }
  0x81   :  { %v984_v12 = vmul.f32 %v817_v8, %v70_v11 }
  0x83   :  { %v79_v15 = vand.u32 2139095040, %v984_v12  ;;  %v76_v19 = vand.u32 2147483647, %v984_v12  ;;  %vm78_vm12 = vcmp.lt.s32.totalorder %v984_v12, 0 }
  0x85   :  { %v80_v16 = vshrl.u32 %v79_v15, 23  ;;  %v83_v24 = vand.u32 8388607, %v76_v19  ;;  %vm77_vm13 = vcmp.le.f32.partialorder %v76_v19, 0.7853982 }
  0x87   :  { %v675_v20 = vadd.s32 4294967169, %v80_v16  ;;  %v84_v28 = vor.u32 8388608, %v83_v24 }
  0x89   :  { %v86_v21 = vadd.s32 1, %v675_v20  ;;  %v1000_v49 = vshll.u32 %v84_v28, 8 }
  0x8b   :  { %vm87_vm0 = vcmp.gt.s32.totalorder %v86_v21, 0  ;;  %v125_v62 = vand.u32 65535, %v1000_v49  ;;  %v126_v1 = vshrl.u32 %v1000_v49, 16 }
  0x8c   :  { %v88_v25 = vsel %vm87_vm0, %v86_v21, 0 }
  0x8d   :  { %v90_v26 = vand.u32 31, %v88_v25  ;;  %v990_v30 = vshrl.u32 %v88_v25, 5 }
  0x8f   :  { %v992_v31 = vsub.s32 32, %v90_v26  ;;  %v93_v33 = vshll.u32 %v911_v32, %v90_v26  ;;  %v96_v35 = vshll.u32 %v912_v34, %v90_v26  ;;  %v99_v37 = vshll.u32 %v913_v36, %v90_v26 }
  0x90   :  { %v102_v39 = vshll.u32 %v914_v38, %v90_v26  ;;  %v105_v46 = vshll.u32 %v915_v43, %v90_v26  ;;  %vm108_vm1 = vcmp.lt.s32.totalorder %v990_v30, 1  ;;  %vm111_vm2 = vcmp.lt.s32.totalorder %v990_v30, 4 }
  0x91   :  { %v94_v40 = vshrl.u32 %v912_v34, %v992_v31  ;;  %v97_v41 = vshrl.u32 %v913_v36, %v992_v31  ;;  %v100_v42 = vshrl.u32 %v914_v38, %v992_v31  ;;  %v103_v44 = vshrl.u32 %v915_v43, %v992_v31 }
  0x92   :  { %v106_v48 = vshrl.u32 %v916_v47, %v992_v31  ;;  %vm110_vm3 = vcmp.lt.s32.totalorder %v990_v30, 3  ;;  %vm109_vm4 = vcmp.lt.s32.totalorder %v990_v30, 2  ;;  %v92_v27 = vshrl.u32 %v911_v32, %v992_v31 }
  0x93   :  { %v95_v51 = vor.u32 %v94_v40, %v93_v33  ;;  %v98_v52 = vor.u32 %v97_v41, %v96_v35  ;;  %v101_v53 = vor.u32 %v100_v42, %v99_v37  ;;  %v104_v54 = vor.u32 %v103_v44, %v102_v39 }
  0x94   :  { %v107_v55 = vor.u32 %v106_v48, %v105_v46 }
  0x95   :  { %v116_v56 = vsel %vm108_vm1, %v95_v51, %v98_v52  ;;  %v117_v57 = vsel %vm111_vm2, %v104_v54, 920167782  ;;  %v120_v58 = vsel %vm108_vm1, %v98_v52, %v101_v53  ;;  %v113_v24 = vsel %vm111_vm2, %v101_v53, 2102212464 }
  0x96   :  { %v118_v59 = vsel %vm110_vm3, %v101_v53, %v117_v57  ;;  %v121_v60 = vsel %vm111_vm2, %v107_v55, 1326507024  ;;  %v112_v36 = vsel %vm108_vm1, %v92_v27, %v95_v51  ;;  %v114_v37 = vsel %vm110_vm3, %v98_v52, %v113_v24 }
  0x97   :  { %v122_v61 = vsel %vm110_vm3, %v104_v54, %v121_v60  ;;  %v119_v63 = vsel %vm109_vm4, %v116_v56, %v118_v59  ;;  %v115_v32 = vsel %vm109_vm4, %v112_v36, %v114_v37 }
  0x98   :  { %v123_v2 = vsel %vm109_vm4, %v120_v58, %v122_v61  ;;  %v149_v3 = vand.u32 65535, %v119_v63  ;;  %v150_v4 = vshrl.u32 %v119_v63, 16  ;;  %v169_v46 = vmul.u32 %v1000_v49, %v115_v32 }
  0x99   :  { %v127_v5 = vand.u32 65535, %v123_v2  ;;  %v128_v6 = vshrl.u32 %v123_v2, 16  ;;  %vm219_vm4 = vweird.f32 %v984_v12 }
  0x9a   :  { %v152_v7 = vmul.u32 %v150_v4, %v125_v62  ;;  %v153_v8 = vmul.u32 %v149_v3, %v126_v1  ;;  %v151_v11 = vmul.u32 %v149_v3, %v125_v62  ;;  %v154_v16 = vmul.u32 %v150_v4, %v126_v1  ;;  %v800_v3 = vld [vmem:[#allocation5 + $0x38] sm:$0xff] }
  0x9b   :  { %v130_v9 = vmul.u32 %v128_v6, %v125_v62  ;;  %v131_v10 = vmul.u32 %v127_v5, %v126_v1  ;;  %v129_v14 = vmul.u32 %v127_v5, %v125_v62  ;;  %v132_v17 = vmul.u32 %v128_v6, %v126_v1  ;;  %620 = vmatpush.bf16.msra.mxu2 %v800_v3 }
  0x9c   :  { %v155_v13 = vshll.u32 %v152_v7, 16  ;;  %v157_v18 = vshll.u32 %v153_v8, 16  ;;  %v156_v34 = vshrl.u32 %v152_v7, 16  ;;  %v158_v40 = vshrl.u32 %v153_v8, 16 }
  0x9d   :  { %v133_v15 = vshll.u32 %v130_v9, 16  ;;  %v135_v21 = vshll.u32 %v131_v10, 16  ;;  %v134_v38 = vshrl.u32 %v130_v9, 16  ;;  %v136_v42 = vshrl.u32 %v131_v10, 16 }
  0x9e   :  { %vm159_vm5 = vc.u32 %v151_v11, %v155_v13  ;;  %v161_v20 = vadd.s32 %v155_v13, %v151_v11 }
  0x9f   :  { %vm137_vm6 = vc.u32 %v129_v14, %v133_v15  ;;  %v139_v22 = vadd.s32 %v133_v15, %v129_v14  ;;  %v160_v23 = vsel %vm159_vm5, 1, %v909_v0 }
  0xa0   :  { %v138_v25 = vsel %vm137_vm6, 1, %v909_v0  ;;  %v162_v26 = vadd.s32 %v160_v23, %v154_v16  ;;  %vm163_vm7 = vc.u32 %v161_v20, %v157_v18 }
  0xa1   :  { %v140_v28 = vadd.s32 %v138_v25, %v132_v17  ;;  %vm141_vm8 = vc.u32 %v139_v22, %v135_v21  ;;  %v164_v29 = vsel %vm163_vm7, 1, %v909_v0 }
  0xa2   :  { %v142_v33 = vsel %vm141_vm8, 1, %v909_v0  ;;  %v166_v35 = vadd.s32 %v164_v29, %v162_v26  ;;  %v165_v0 = vadd.s32 %v161_v20, %v157_v18 }
  0xa3   :  { %v144_v39 = vadd.s32 %v142_v33, %v140_v28 }
  0xa4   :  { %v167_v41 = vadd.s32 %v166_v35, %v156_v34 }
  0xa5   :  { %v145_v31 = vadd.s32 %v144_v39, %v134_v38 }
  0xa6   :  { %v168_v43 = vadd.s32 %v167_v41, %v158_v40 }
  0xa7   :  { %v146_v44 = vadd.s32 %v145_v31, %v136_v42 }
  0xa8   :  { %v172_v45 = vadd.s32 1, %v168_v43 }
  0xa9   :  { %vm171_vm9 = vc.u32 %v146_v44, %v165_v0  ;;  %v170_v58 = vadd.s32 %v165_v0, %v146_v44  ;;  %v799_v44 = vld [vmem:[#allocation5 + $0x30] sm:$0xff]  ;;  %v798_v0 = vld [vmem:[#allocation5 + $0x28] sm:$0xff] }
  0xaa   :  { %v173_v47 = vsel %vm171_vm9, %v172_v45, %v168_v43  ;;  %621 = vmatpush.bf16.msra.mxu2 %v799_v44  ;;  %v797_v45 = vld [vmem:[#allocation5 + $0x20] sm:$0xff] }
  0xab   :  { %v174_v48 = vadd.s32 %v173_v47, %v169_v46  ;;  %v796_v46 = vld [vmem:[#allocation5 + $0x18] sm:$0xff]  ;;  %v795_v47 = vld [vmem:[#allocation5 + $0x10] sm:$0xff] }
  0xad   :  { %v175_v50 = vadd.s32 536870912, %v174_v48 }
  0xae   :  { %622 = vmatpush.bf16.msra.mxu2 %v798_v0 }
  0xaf   :  { %v176_v51 = vshrl.u32 %v175_v50, 30  ;;  %v820_v50 = vld [vmem:[%s1066_s4] ss:$0 sm:$0xff] }
  0xb1   :  { %v177_v52 = vshll.u32 %v176_v51, 30  ;;  %v200_v9 = vsub.s32 4, %v176_v51 }
  0xb2   :  { %623 = vmatpush.bf16.msra.mxu2 %v797_v45 }
  0xb3   :  { %v178_v53 = vsub.s32 %v174_v48, %v177_v52  ;;  %v201_v15 = vsel %vm78_vm12, %v200_v9, %v176_v51  ;;  %v794_v48 = vld [vmem:[#allocation5 + $0x8] sm:$0xff] }
  0xb4   :  { %v203_v18 = vsel %vm77_vm13, 0, %v201_v15 }
  0xb5   :  { %vm179_vm10 = vcmp.lt.s32.totalorder %v178_v53, 0  ;;  %v180_v54 = vsub.s32 0, %v178_v53  ;;  %v374_v24 = vadd.s32 3, %v203_v18  ;;  %v220_v28 = vand.u32 3, %v203_v18 }
  0xb6   :  { %624 = vmatpush.bf16.msra.mxu2 %v796_v46 }
  0xb7   :  { %v181_v55 = vsel %vm179_vm10, %v180_v54, %v178_v53  ;;  %v375_v29 = vand.u32 3, %v374_v24  ;;  %vm221_vm14 = vcmp.lt.s32.totalorder %v220_v28, 2  ;;  %vm222_vm15 = vcmp.eq.s32.totalorder %v220_v28, 0 }
  0xb8   :  { %v182_v56 = vclz %v181_v55  ;;  %vm225_vm0 = vcmp.eq.s32.totalorder %v220_v28, 2 }
  0xb9   :  { %vm376_vm1 = vcmp.lt.s32.totalorder %v375_v29, 2  ;;  %vm377_vm2 = vcmp.eq.s32.totalorder %v375_v29, 0  ;;  %vm380_vm3 = vcmp.eq.s32.totalorder %v375_v29, 2 }
  0xba   :  { %v676_v57 = vadd.s32 4294967294, %v182_v56  ;;  %625 = vmatpush.bf16.msra.mxu2 %v795_v47 }
  0xbc   :  { %vm677_vm11 = vcmp.lt.s32.totalorder %v676_v57, 0 }
  0xbd   :  { %v185_v30 = vsel %vm677_vm11, 0, %v676_v57 }
  0xbe   :  { %v186_v59 = vsub.s32 32, %v185_v30  ;;  %v190_v60 = vsub.s32 4294967266, %v185_v30  ;;  %v187_v61 = vshll.u32 %v178_v53, %v185_v30  ;;  %626 = vmatpush.bf16.msra.mxu2 %v794_v48 }
  0xc0   :  { %v188_v62 = vshrl.u32 %v170_v58, %v186_v59  ;;  %v191_v49 = vadd.s32 127, %v190_v60 }
  0xc2   :  { %v189_v63 = vor.u32 %v188_v62, %v187_v61  ;;  %v192_v1 = vshll.u32 %v191_v49, 23  ;;  %v818_v49 = vld [vmem:[%s1069_s7 + $0x1] ss:$0 sm:$0xff] }
  0xc4   :  { %v193_v2 = vor.u32 4788187, %v192_v1  ;;  %v196_v5 = vcvt.s32.f32 %v189_v63  ;;  %v819_v63 = vld [vmem:[%s1069_s7] ss:$0 sm:$0xff]  ;;  %v645_v1 = vpop.permute.xlu1 %644  ;;  %s664_s7 = sshll.u32 %s1071_s9, 4  ;;  %s665_s7 = int_to_ptr.hbm [resolvable:$true] %s664_s7 }
  0xc5   :  { %v648_v3 = vmul.f32 %v818_v49, %v645_v1 }
  0xc6   :  { %v194_v4 = vand.u32 2147483647, %v193_v2  ;;  %v638_v2 = vpop.permute.xlu0 %637 }
  0xc8   :  { %v197_v6 = vmul.f32 %v196_v5, %v194_v4  ;;  %v641_v4 = vmul.f32 %v819_v63, %v638_v2 }
  0xca   :  { %v198_v7 = vxor.u32 2147483648, %v197_v6  ;;  %v649_v5 = vadd.f32 %v648_v3, %v641_v4 }
  0xcc   :  { %v199_v8 = vsel %vm78_vm12, %v198_v7, %v197_v6  ;;  %v821_v6 = vld [vmem:[%s1068_s6] ss:$0 sm:$0xff] }
  0xcd   :  { %v202_v10 = vsel %vm77_vm13, %v984_v12, %v199_v8  ;;  %v793_v12 = vld [vmem:[#allocation5] sm:$0xff] }
  0xce   :  { %v204_v11 = vmul.f32 %v202_v10, %v202_v10  ;;  %627 = vmatpush.bf16.msra.mxu2 %v793_v12  ;;  %v822_v7 = vld [vmem:[%s1070_s8] ss:$0 sm:$0xff] }
  0xd0   :  { %v205_v13 = vmul.f32 -0.001358992, %v204_v11  ;;  %v212_v14 = vmul.f32 -0.00019511016, %v204_v11 }
  0xd2   :  { %v206_v16 = vadd.f32 0.041655596, %v205_v13  ;;  %v213_v17 = vadd.f32 0.008332121, %v212_v14 }
  0xd4   :  { %v207_v20 = vmul.f32 %v206_v16, %v204_v11  ;;  %v214_v21 = vmul.f32 %v213_v17, %v204_v11 }
  0xd6   :  { %v208_v22 = vadd.f32 -0.4999988, %v207_v20  ;;  %v215_v23 = vadd.f32 -0.16666654, %v214_v21 }
  0xd8   :  { %v209_v25 = vmul.f32 %v208_v22, %v204_v11  ;;  %v216_v26 = vmul.f32 %v215_v23, %v204_v11 }
  0xda   :  { %v210_v27 = vadd.f32 1.0, %v209_v25  ;;  %v217_v19 = vadd.f32 1.0, %v216_v26 }
  0xdc   :  { %v218_v33 = vmul.f32 %v217_v19, %v202_v10  ;;  %v226_v34 = vxor.u32 2147483648, %v210_v27  ;;  %v654_v10 = vadd.f32 %v822_v7, %v649_v5 }
  0xde   :  { %v223_v35 = vxor.u32 2147483648, %v218_v33  ;;  %v227_v37 = vsel %vm225_vm0, %v226_v34, %v218_v33  ;;  %v382_v39 = vsel %vm380_vm3, %v226_v34, %v218_v33 }
  0xe0   :  { %v224_v36 = vsel %vm222_vm15, %v210_v27, %v223_v35  ;;  %v379_v38 = vsel %vm377_vm2, %v210_v27, %v223_v35 }
  0xe1   :  { %v228_v40 = vsel %vm221_vm14, %v224_v36, %v227_v37  ;;  %v383_v41 = vsel %vm376_vm1, %v379_v38, %v382_v39 }
  0xe2   :  { %v229_v42 = vsel %vm219_vm4, nan, %v228_v40  ;;  %v384_v31 = vsel %vm219_vm4, nan, %v383_v41 }
  0xe3   :  { %v385_v32 = vpack.c.bf16 %v229_v42, %v229_v42  ;;  %v386_v43 = vpack.c.bf16 %v384_v31, %v384_v31 }
  0xe5   :  { %527 = vmatmul.bf16.vlgmr.msra.gmra.mxu0 %v385_v32  ;;  %540 = vmatmul.bf16.vlgmr.msra.gmra.mxu1 %v386_v43 }
 0x162   :  { %v528_v51 = vpop.f32.mrf.mxu0  ;;  %v541_v52 = vpop.f32.mrf.mxu1 }
 0x163   :  { %v529_v53 = vadd.f32 %v820_v50, %v528_v51 }
 0x165   :  { %v542_v54 = vadd.f32 %v541_v52, %v529_v53 }
 0x167   :  { %v545_v55 = vsub.f32 0.0, %v542_v54 }
 0x169   :  { %v546_v56 = vmul.f32 1.442695, %v545_v55 }
 0x16a   :  { %v530_v57 = vpop.f32.mrf.mxu0  ;;  %v543_v30 = vpop.f32.mrf.mxu1 }
 0x16b   :  { %823 = vpow2.f32 %v546_v56 }
 0x171   :  { %v824_v58 = vpop.eup %823 }
 0x172   :  { %v548_v59 = vadd.f32 1.0, %v824_v58 }
 0x174   :  { %825 = vrcp.f32 %v548_v59 }
 0x17a   :  { %v826_v60 = vpop.eup %825 }
 0x17b   :  { %v550_v61 = vmul.f32 %v826_v60, %v542_v54 }
 0x17d   :  { %v551_v62 = vpack.c.bf16 %v550_v61, %v550_v61 }
 0x17f   :  { %628 = vmatmul.bf16.vlgmr.msra.gmra.mxu2 %v551_v62 }
 0x202   :  { %v629_v8 = vpop.f32.mrf.mxu2 }
 0x203   :  { %v630_v9 = vadd.f32 %v821_v6, %v629_v8 }
 0x205   :  { %v655_v11 = vmul.f32 %v654_v10, %v630_v9 }
 0x207   :  { %656 = vst [vmem:[#allocation7] sm:$0xff] %v655_v11 }
 0x208   :  { %667 = dma.vmem_to_hbm [thread:$0]  %s663_s11, 128, %s665_s7, [#allocation4]  }
 0x20a   :  { %v631_v13 = vpop.f32.mrf.mxu2 }
 0x20b   :  { %903 = dma.done.wait [#allocation4], 128  }
 0x20c   :  { %904 = vsyncadd [#allocation4], 4294967168 }
 0x20d   :  { %672 = vsyncpa [#allocation3], 1 }
 0x20e   :  { %673 = vsyncpa [#allocation6], 1 }
 0x20f   :  { %674 = vsyncpa [#allocation4], 1 }

</bundles_post_ra>
